<compile_context>
chip_gen: v5e
topology: v5e:2x2
jax: 0.10.0
libtpu: 0.0.40
codegen_flags: <defaults>
</compile_context>

<pallas_src>
import functools

import jax
import jax.numpy as jnp
from jax.experimental import pallas as pl
from jax.experimental.pallas import tpu as pltpu


def _round_up(x, m):
    return -(-x // m) * m


def _elu(x):
    # ELU with alpha=1 (matches F.elu default); exp only sees the <=0 side.
    return jnp.where(x > 0, x, jnp.exp(jnp.minimum(x, 0.0)) - 1.0)


def _build_layout(na, e):
    """128-lane-aligned banks for the fused hypernet output.

    Banks (in lane order): w1 (na*e), b1 (e) + 1 skip lane, w_final (e),
    V[0] (e), V[2]-weight-row (e, const-only), q replicated per agent (na*e).
    Every bank that is sliced per-row starts on a 128-lane boundary.
    """
    w = na * e
    offs, cur = {}, 0
    for name, width, align in (("w1", w, True), ("b1", e, True),
                               ("skip", 1, False), ("wf", e, True),
                               ("v1", e, True), ("v2", e, True),
                               ("q", w, True)):
        if align:
            cur = _round_up(cur, 128)
        offs[name] = cur
        cur += width
    return offs, _round_up(cur, 128)


def qmix_kernel(x_ref, wcat_ref, const_ref, scal_ref, out_ref, *,
                na, e, offs, gated, include_skip, use_roll):
    w = na * e
    x = x_ref[...]                                             # (T, S+NA) bf16

    # One fused MXU pass for all hypernet linears + q replication + skip sum,
    # f32 accumulation; one broadcast add applies every bias / constant.
    h = jnp.dot(x, wcat_ref[...], preferred_element_type=jnp.float32)
    h = h + const_ref[...]                                     # (T, n_cat) f32

    w1 = jnp.abs(h[:, offs["w1"]:offs["w1"] + w])              # (T, NA*E)
    b1 = h[:, offs["b1"]:offs["b1"] + e]                       # (T, E)
    w_final = jnp.abs(h[:, offs["wf"]:offs["wf"] + e])         # (T, E)
    h_v = jnp.maximum(h[:, offs["v1"]:offs["v1"] + e], 0.0)    # (T, E) ReLU(V0)
    w_v2 = h[:, offs["v2"]:offs["v2"] + e]                     # (T, E) V[2] row
    q_rep = h[:, offs["q"]:offs["q"] + w]                      # (T, NA*E)

    # bmm(agent_qs, w1): full-lane FMA, then segment-sum the na groups of e
    # lanes with log2(na) cyclic lane rolls (XLU has slack here).
    prod = q_rep * w1                                          # (T, NA*E)
    if use_roll:
        z = prod
        shift = w // 2
        while shift >= e:
            z = z + pltpu.roll(z, shift, axis=1)
            shift //= 2
        seg = z[:, 0:e]
    else:  # generic fallback (na not a power of two / unaligned w1 bank)
        seg = prod[:, 0:e]
        for a in range(1, na):
            seg = seg + prod[:, a * e:(a + 1) * e]
    hidden = _elu(seg + b1)                                    # (T, E)

    gate = scal_ref[0]                                         # SMEM scalar
    b_v2 = scal_ref[1]                                         # SMEM scalar

    mixed = hidden * w_final
    if gated:
        mixed = mixed * gate
    mixed = mixed + h_v * w_v2                                 # (T, E)
    y = jnp.sum(mixed, axis=1, keepdims=True) + b_v2           # (T, 1)
    if include_skip:
        y = y + h[:, offs["skip"]:offs["skip"] + 1]            # sum_a q (MXU lane)
    out_ref[...] = y.astype(out_ref.dtype)


def _pack_operands(params, na, e, sdim, offs, n_cat, matmul_dtype, gated):
    w = na * e
    kin = sdim + na
    w_cat = jnp.zeros((kin, n_cat), jnp.float32)
    w_cat = w_cat.at[:sdim, offs["w1"]:offs["w1"] + w].set(params["w_w1"])
    w_cat = w_cat.at[:sdim, offs["b1"]:offs["b1"] + e].set(params["w_b1"])
    w_cat = w_cat.at[:sdim, offs["wf"]:offs["wf"] + e].set(params["w_wf"])
    w_cat = w_cat.at[:sdim, offs["v1"]:offs["v1"] + e].set(params["w_v1"])
    # q rows: replicate each agent's q across its e-lane group of the 'q' bank
    # (the MXU does the lane broadcast for free) and sum all agents into the
    # single 'skip' lane.
    rep = jnp.repeat(jnp.eye(na, dtype=jnp.float32), e, axis=1)   # (na, na*e)
    w_cat = w_cat.at[sdim:, offs["q"]:offs["q"] + w].set(rep)
    w_cat = w_cat.at[sdim:, offs["skip"]].set(1.0)
    w_cat = w_cat.astype(matmul_dtype)

    # Single f32 constant row: all biases, plus V[2]'s weight row in its own
    # bank (the matching matmul columns are zero, so those h lanes equal the
    # weight row exactly - nothing read from h is ever undefined).
    const = jnp.zeros((1, n_cat), jnp.float32)
    const = const.at[:, offs["w1"]:offs["w1"] + w].set(params["b_w1"])
    const = const.at[:, offs["b1"]:offs["b1"] + e].set(params["b_b1"])
    const = const.at[:, offs["wf"]:offs["wf"] + e].set(params["b_wf"])
    const = const.at[:, offs["v1"]:offs["v1"] + e].set(params["b_v1"])
    const = const.at[:, offs["v2"]:offs["v2"] + e].set(
        params["w_v2"].reshape(1, e))

    gate = (params["gate"].reshape(()).astype(jnp.float32)
            if gated else jnp.float32(1.0))
    scal = jnp.stack([gate, params["b_v2"].reshape(()).astype(jnp.float32)])
    return w_cat, const, scal


def _vmem_capacity_bytes():
    try:
        return int(pltpu.get_tpu_info().vmem_capacity_bytes)
    except Exception:
        return 64 * 1024 * 1024          # conservative (v7x-sized) fallback


def _pick_row_tile(b):
    """Few, large grid steps.  128-MiB-VMEM parts (v5e/v6e, one TC): up to
    4096 rows per step, one step when the batch fits.  64-MiB parts (v7x,
    two TCs): cap 2048 and keep an even number of >=2 steps once there is
    enough work to split."""
    big_vmem = _vmem_capacity_bytes() >= 100 * 1024 * 1024
    cap = 4096 if big_vmem else 2048
    if big_vmem:
        steps = max(1, -(-b // cap))
    else:
        steps = max(2, -(-b // cap)) if b > 1024 else 1
        if steps > 1:
            steps = _round_up(steps, 2)
    tile = _round_up(max(-(-b // steps), 8), 8)
    return tile, big_vmem


def _resident_spec(shape):
    """Constant-index operand: pin with a single pipeline buffer if available."""
    idx = lambda i: (0, 0)
    buffered = getattr(pl, "Buffered", None)
    if buffered is not None:
        try:
            return pl.BlockSpec(shape, idx, pipeline_mode=buffered(1))
        except TypeError:
            pass
    return pl.BlockSpec(shape, idx)


def pevfa_qmixer_forward(agent_qs, states, params, *, gated=True,
                         skip_connections=True, row_tile=None,
                         matmul_dtype=jnp.bfloat16):
    """agent_qs: (bs, T, NA); states: (bs, T, S). Returns (bs, T, 1) f32."""
    bs, t, na = agent_qs.shape
    sdim = states.shape[-1]
    e = params["w_b1"].shape[1]
    b = bs * t

    if row_tile is None:
        row_tile, big_vmem = _pick_row_tile(b)
    else:
        big_vmem = _vmem_capacity_bytes() >= 100 * 1024 * 1024
    assert row_tile % 8 == 0
    b_pad = _round_up(b, row_tile)

    offs, n_cat = _build_layout(na, e)
    w_cat, const, scal = _pack_operands(params, na, e, sdim, offs, n_cat,
                                        matmul_dtype, gated)

    # Fold agent_qs into the state stream: one bf16 DMA stream instead of a
    # separate 128-lane-padded f32 qs block.
    x = jnp.concatenate([states.reshape(b, sdim),
                         agent_qs.reshape(b, na)], axis=1).astype(matmul_dtype)
    if b_pad != b:
        x = jnp.pad(x, ((0, b_pad - b), (0, 0)))

    use_roll = (na & (na - 1)) == 0 and (na * e) % 128 == 0

    kernel = functools.partial(qmix_kernel, na=na, e=e, offs=offs,
                               gated=gated, include_skip=skip_connections,
                               use_roll=use_roll)

    out = pl.pallas_call(
        kernel,
        out_shape=jax.ShapeDtypeStruct((b_pad, 1), jnp.float32),
        grid=(b_pad // row_tile,),
        in_specs=[
            pl.BlockSpec((row_tile, sdim + na), lambda i: (i, 0)),  # [states|q]
            _resident_spec((sdim + na, n_cat)),                     # fused weights
            _resident_spec((1, n_cat)),                             # biases/consts
            pl.BlockSpec(memory_space=pltpu.MemorySpace.SMEM),      # [gate, b_v2]
        ],
        out_specs=pl.BlockSpec((row_tile, 1), lambda i: (i, 0)),
        compiler_params=pltpu.CompilerParams(
            dimension_semantics=("parallel",),
            vmem_limit_bytes=(96 if big_vmem else 40) * 1024 * 1024,
        ),
    )(x, w_cat, const, scal)
    return out[:b].reshape(bs, t, 1)


def reference_forward(agent_qs, states, params, *, gated=True,
                      skip_connections=True, matmul_dtype=jnp.float32):
    """Pure-JAX mirror of the PyTorch forward.  `matmul_dtype` reproduces the
    kernel's policy: states, hypernet weights AND agent_qs pass through the
    MXU in that dtype, with f32 accumulation and f32 elementwise math."""
    bs, t, na = agent_qs.shape
    sdim = states.shape[-1]
    e = params["w_b1"].shape[1]
    hi = jax.lax.Precision.HIGHEST
    s = states.reshape(-1, sdim)
    q = agent_qs.reshape(-1, 1, na).astype(matmul_dtype).astype(jnp.float32)

    def hyper(wname, bname):
        return jnp.dot(s.astype(matmul_dtype), params[wname].astype(matmul_dtype),
                       preferred_element_type=jnp.float32,
                       precision=hi) + params[bname]

    w1 = jnp.abs(hyper("w_w1", "b_w1")).reshape(-1, na, e)
    b1 = hyper("w_b1", "b_b1").reshape(-1, 1, e)
    hidden = jax.nn.elu(jnp.einsum("bxn,bne->bxe", q, w1, precision=hi) + b1)
    w_f = jnp.abs(hyper("w_wf", "b_wf")).reshape(-1, e, 1)
    h_v = jax.nn.relu(hyper("w_v1", "b_v1"))
    v = (jnp.dot(h_v, params["w_v2"], precision=hi)
         + params["b_v2"]).reshape(-1, 1, 1)
    y = jnp.einsum("bxe,bey->bxy", hidden, w_f, precision=hi)
    if gated:
        y = y * params["gate"][0]
    y = y + v
    if skip_connections:
        y = y + q.sum(axis=2, keepdims=True)
    return y.reshape(bs, -1, 1)


def init_params(key, state_dim, n_agents, q_embed_dim, embed_dim):
    na = n_agents * q_embed_dim
    keys = jax.random.split(key, 10)
    n = lambda k, shp: jax.random.normal(k, shp, jnp.float32) * 0.1
    return {
        "w_w1": n(keys[0], (state_dim, embed_dim * na)),
        "b_w1": n(keys[1], (1, embed_dim * na)),
        "w_b1": n(keys[2], (state_dim, embed_dim)),
        "b_b1": n(keys[3], (1, embed_dim)),
        "w_wf": n(keys[4], (state_dim, embed_dim)),
        "b_wf": n(keys[5], (1, embed_dim)),
        "w_v1": n(keys[6], (state_dim, embed_dim)),
        "b_v1": n(keys[7], (1, embed_dim)),
        "w_v2": n(keys[8], (embed_dim, 1)),
        "b_v2": n(keys[9], (1, 1)),
        "gate": jnp.full((1,), 0.5, jnp.float32),
    }


if __name__ == "__main__":
    # Small synthetic config consistent with the module.
    bs, t = 2, 8
    n_agents, q_embed_dim = 4, 1
    state_dim, embed_dim = 32, 32
    na = n_agents * q_embed_dim

    key = jax.random.PRNGKey(0)
    k_p, k_q, k_s = jax.random.split(key, 3)
    params = init_params(k_p, state_dim, n_agents, q_embed_dim, embed_dim)
    agent_qs = jax.random.normal(k_q, (bs, t, na), jnp.float32)
    states = jax.random.normal(k_s, (bs, t, state_dim), jnp.float32)

    q_tot = pevfa_qmixer_forward(agent_qs, states, params)
    q_tot = jax.block_until_ready(q_tot)
    assert q_tot.shape == (bs, t, 1)

    # Tight check against a JAX reference that uses the same bf16-operand /
    # f32-accumulate matmul policy as the kernel.
    q_ref_policy = reference_forward(agent_qs, states, params,
                                     matmul_dtype=jnp.bfloat16)
    assert jnp.allclose(q_tot, q_ref_policy, atol=3e-3, rtol=3e-3), (
        float(jnp.max(jnp.abs(q_tot - q_ref_policy))))

    # Loose sanity check against the full-f32 module semantics (bf16 MXU
    # operands introduce ~0.2% rounding, well below these bounds).
    q_ref_f32 = reference_forward(agent_qs, states, params)
    assert jnp.allclose(q_tot, q_ref_f32, atol=0.2, rtol=0.2), (
        float(jnp.max(jnp.abs(q_tot - q_ref_f32))))

    print("KERNEL_OK")
</pallas_src>

<mosaic_0001>
module attributes {stable_mosaic.version = 11 : i64} {
  func.func @qmix_kernel(%arg0: i32, %arg1: memref<16x36xbf16, #tpu.memory_space<vmem>>, %arg2: memref<36x768xbf16, #tpu.memory_space<vmem>>, %arg3: memref<1x768xf32, #tpu.memory_space<vmem>>, %arg4: memref<2xf32, #tpu.memory_space<smem>>, %arg5: memref<16x1xf32, #tpu.memory_space<vmem>>) attributes {dimension_semantics = [#tpu.dimension_semantics<parallel>], iteration_bounds = array<i64: 1>, scalar_prefetch = 0 : i64, scratch_operands = 0 : i64, tpu.core_type = #tpu.core_type<tc>, window_params = [{transform_indices = @transform_0, window_bounds = array<i64: 16, 36>}, {pipeline_mode = #tpu.pipeline_mode<synchronous>, transform_indices = @transform_1, window_bounds = array<i64: 36, 768>}, {pipeline_mode = #tpu.pipeline_mode<synchronous>, transform_indices = @transform_2, window_bounds = array<i64: 1, 768>}, {transform_indices = @transform_3, window_bounds = array<i64: 2>}, {transform_indices = @transform_4, window_bounds = array<i64: 16, 1>}]} {
    %c0 = arith.constant 0 : index
    %c0_0 = arith.constant 0 : index
    %0 = vector.load %arg1[%c0, %c0_0] : memref<16x36xbf16, #tpu.memory_space<vmem>>, vector<16x36xbf16>
    %c0_1 = arith.constant 0 : index
    %c0_2 = arith.constant 0 : index
    %1 = vector.load %arg2[%c0_1, %c0_2] : memref<36x768xbf16, #tpu.memory_space<vmem>>, vector<36x768xbf16>
    %cst = arith.constant dense<0.000000e+00> : vector<16x768xf32>
    %2 = tpu.matmul %0, %1, %cst {dimension_numbers = #tpu.dot_dimension_numbers<[1], [0], [0], [1], [0, 0, 1, 1], [], []>} : vector<16x36xbf16>, vector<36x768xbf16>, vector<16x768xf32> -> vector<16x768xf32>
    %c0_3 = arith.constant 0 : index
    %c0_4 = arith.constant 0 : index
    %3 = vector.load %arg3[%c0_3, %c0_4] : memref<1x768xf32, #tpu.memory_space<vmem>>, vector<1x768xf32>
    %4 = vector.broadcast %3 : vector<1x768xf32> to vector<16x768xf32>
    %5 = arith.addf %2, %4 : vector<16x768xf32>
    %6 = vector.extract_strided_slice %5 {offsets = [0, 0], sizes = [16, 128], strides = [1, 1]} : vector<16x768xf32> to vector<16x128xf32>
    %7 = math.absf %6 : vector<16x128xf32>
    %8 = vector.extract_strided_slice %5 {offsets = [0, 128], sizes = [16, 32], strides = [1, 1]} : vector<16x768xf32> to vector<16x32xf32>
    %9 = vector.extract_strided_slice %5 {offsets = [0, 256], sizes = [16, 32], strides = [1, 1]} : vector<16x768xf32> to vector<16x32xf32>
    %10 = math.absf %9 : vector<16x32xf32>
    %11 = vector.extract_strided_slice %5 {offsets = [0, 384], sizes = [16, 32], strides = [1, 1]} : vector<16x768xf32> to vector<16x32xf32>
    %cst_5 = arith.constant 0.000000e+00 : f32
    %12 = vector.broadcast %cst_5 : f32 to vector<16x32xf32>
    %13 = arith.maximumf %11, %12 : vector<16x32xf32>
    %14 = vector.extract_strided_slice %5 {offsets = [0, 512], sizes = [16, 32], strides = [1, 1]} : vector<16x768xf32> to vector<16x32xf32>
    %15 = vector.extract_strided_slice %5 {offsets = [0, 640], sizes = [16, 128], strides = [1, 1]} : vector<16x768xf32> to vector<16x128xf32>
    %16 = arith.mulf %15, %7 : vector<16x128xf32>
    %c64_i32 = arith.constant 64 : i32
    %17 = tpu.dynamic_rotate %16 by %c64_i32 dim 1 : vector<16x128xf32>, i32 -> vector<16x128xf32>
    %18 = arith.addf %16, %17 : vector<16x128xf32>
    %c32_i32 = arith.constant 32 : i32
    %19 = tpu.dynamic_rotate %18 by %c32_i32 dim 1 : vector<16x128xf32>, i32 -> vector<16x128xf32>
    %20 = arith.addf %18, %19 : vector<16x128xf32>
    %21 = vector.extract_strided_slice %20 {offsets = [0, 0], sizes = [16, 32], strides = [1, 1]} : vector<16x128xf32> to vector<16x32xf32>
    %22 = arith.addf %21, %8 : vector<16x32xf32>
    %cst_6 = arith.constant 0.000000e+00 : f32
    %23 = vector.broadcast %cst_6 : f32 to vector<16x32xf32>
    %24 = arith.cmpf ogt, %22, %23 : vector<16x32xf32>
    %cst_7 = arith.constant 0.000000e+00 : f32
    %25 = vector.broadcast %cst_7 : f32 to vector<16x32xf32>
    %26 = arith.minimumf %22, %25 : vector<16x32xf32>
    %27 = math.exp %26 : vector<16x32xf32>
    %cst_8 = arith.constant 1.000000e+00 : f32
    %28 = vector.broadcast %cst_8 : f32 to vector<16x32xf32>
    %29 = arith.subf %27, %28 : vector<16x32xf32>
    %30 = arith.select %24, %22, %29 : vector<16x32xi1>, vector<16x32xf32>
    %c0_9 = arith.constant 0 : index
    %31 = memref.load %arg4[%c0_9] : memref<2xf32, #tpu.memory_space<smem>>
    %c1 = arith.constant 1 : index
    %32 = memref.load %arg4[%c1] : memref<2xf32, #tpu.memory_space<smem>>
    %33 = arith.mulf %30, %10 : vector<16x32xf32>
    %34 = vector.broadcast %31 : f32 to vector<16x32xf32>
    %35 = arith.mulf %33, %34 : vector<16x32xf32>
    %36 = arith.mulf %13, %14 : vector<16x32xf32>
    %37 = arith.addf %35, %36 : vector<16x32xf32>
    %cst_10 = arith.constant dense<0.000000e+00> : vector<16xf32>
    %38 = vector.multi_reduction <add>, %37, %cst_10 [1] : vector<16x32xf32> to vector<16xf32>
    %39 = vector.shape_cast %38 : vector<16xf32> to vector<16x1xf32>
    %40 = vector.broadcast %32 : f32 to vector<16x1xf32>
    %41 = arith.addf %39, %40 : vector<16x1xf32>
    %42 = vector.extract_strided_slice %5 {offsets = [0, 160], sizes = [16, 1], strides = [1, 1]} : vector<16x768xf32> to vector<16x1xf32>
    %43 = arith.addf %41, %42 : vector<16x1xf32>
    %c0_11 = arith.constant 0 : index
    %c0_12 = arith.constant 0 : index
    %44 = vector.load %arg5[%c0_11, %c0_12] : memref<16x1xf32, #tpu.memory_space<vmem>>, vector<16x1xf32>
    tpu.vector_store %arg5[%c0_11, %c0_12], %43 {strides = array<i32>} : memref<16x1xf32, #tpu.memory_space<vmem>>, vector<16x1xf32>,
    return
  }
  func.func @transform_0(%arg0: i32) -> (i32, i32) {
    %c0_i32 = arith.constant 0 : i32
    %c0_i32_0 = arith.constant 0 : i32
    return %arg0, %c0_i32 : i32, i32
  }
  func.func @transform_1(%arg0: i32) -> (i32, i32) {
    %c0_i32 = arith.constant 0 : i32
    %c0_i32_0 = arith.constant 0 : i32
    %c0_i32_1 = arith.constant 0 : i32
    return %c0_i32, %c0_i32_0 : i32, i32
  }
  func.func @transform_2(%arg0: i32) -> (i32, i32) {
    %c0_i32 = arith.constant 0 : i32
    %c0_i32_0 = arith.constant 0 : i32
    %c0_i32_1 = arith.constant 0 : i32
    return %c0_i32, %c0_i32_0 : i32, i32
  }
  func.func @transform_3(%arg0: i32) -> i32 {
    %c0_i32 = arith.constant 0 : i32
    %c0_i32_0 = arith.constant 0 : i32
    return %c0_i32 : i32
  }
  func.func @transform_4(%arg0: i32) -> (i32, i32) {
    %c0_i32 = arith.constant 0 : i32
    %c0_i32_0 = arith.constant 0 : i32
    return %arg0, %c0_i32 : i32, i32
  }
}

</mosaic_0001>

<bundles_post_ra>
// kernel: tpu_custom_call.1
= control target key start
LH: loop header
LB: loop body
LE: loop exit
PB: predicated region body
PF: predicated region fallthrough
CT: control target
= control target key end

     0   :  { %9 = vsyncpa [#allocation3], 0  ;;  %s627_s0 = inlined_call_operand.hbm [shape: bf16[16,36], index: 0, kind: input, shape index: {}]   ;;  %s628_s1 = inlined_call_operand.hbm [shape: bf16[36,768], index: 1, kind: input, shape index: {}]   ;;  %s629_s2 = inlined_call_operand.hbm [shape: f32[1,768], index: 2, kind: input, shape index: {}]   ;;  %s630_s3 = inlined_call_operand.vmem [shape: f32[2], index: 3, kind: input, shape index: {}]   ;;  %s631_s4 = inlined_call_operand.vmem [shape: f32[16,1], index: 4, kind: output, shape index: {}]  }
   0x1   :  { %10 = vsyncpa [#allocation6], 0  ;;  %s29_s17 = sshll.u32 %s628_s1, 4  ;;  %s30_s17 = int_to_ptr.hbm [resolvable:$true] %s29_s17 }
   0x2   :  { %11 = vsyncpa [#allocation4], 0  ;;  %s547_s18 = smov [#allocation5]   ;;  %s16_s22 = sshll.u32 %s627_s0, 4  ;;  %s17_s22 = int_to_ptr.hbm [resolvable:$true] %s16_s22 }
   0x3   :  { %s31_s19 = sshll.u32 %s547_s18, 4  ;;  %s548_s23 = smov 384   ;;  %s32_s19 = int_to_ptr.vmem [resolvable:$true] %s31_s19 }
   0x4   :  { %s549_s24 = smov 24   ;;  %s550_s25 = smov [#allocation2]  }
   0x5   :  { %37 = dma.hbm_to_vmem [thread:$0]  %s30_s17, 1920, %s32_s19, [#allocation6], %s548_s23, %s548_s23, %s549_s24  }
   0x6   :  { %s18_s26 = sshll.u32 %s550_s25, 4  ;;  %s551_s27 = smov 64   ;;  %s19_s26 = int_to_ptr.vmem [resolvable:$true] %s18_s26 }
   0x7   :  { %s552_s28 = smov 4   ;;  %s43_s30 = sshll.u32 %s629_s2, 4  ;;  %s44_s30 = int_to_ptr.hbm [resolvable:$true] %s43_s30 }
   0x8   :  { %24 = dma.hbm_to_vmem [thread:$0]  %s17_s22, 128, %s19_s26, [#allocation3], %s551_s27, %s551_s27, %s552_s28  }
   0x9   :  { %s553_s5 = smov [#allocation7]   ;;  %s54_s8 = sshll.u32 %s630_s3, 4  ;;  %s55_s8 = int_to_ptr.vmem [resolvable:$true] %s54_s8 }
   0xa   :  { %s45_s6 = sshll.u32 %s553_s5, 4  ;;  %s554_s9 = smov [#allocation8]   ;;  %s46_s6 = int_to_ptr.vmem [resolvable:$true] %s45_s6 }
   0xb   :  { %48 = dma.hbm_to_vmem [thread:$0]  %s44_s30, 96, %s46_s6, [#allocation6]  }
   0xc   :  { %57 = dma.vmem_to_smem %s55_s8, 16, %s554_s9, [#allocation4]  }
   0xd   :  { %541 = dma.done.wait [#allocation3], 128  }
   0xe   :  { %542 = vsyncadd [#allocation3], 4294967168 }
   0xf   :  { %543 = dma.done.wait [#allocation6], 2016  }
  0x10   :  { %544 = vsyncadd [#allocation6], 4294965280 }
  0x11   :  { %545 = dma.done.wait [#allocation4], 16  }
  0x12   :  { %546 = vsyncadd [#allocation4], 4294967280 }
  0x13   :  { %74 = sfence }
  0x14   :  { %v90_v0 = vld [vmem:[#allocation5 + $0x60] sm:$0x33]  ;;  %vm191_vm0 = vcmask 1041408   ;;  %v437_v3 = vld [vmem:[#allocation5 + $0x34] sm:$0xf]  ;;  %v430_v25 = vld [vmem:[#allocation2] sm:$0xff] }
  0x15   :  { %v152_v1 = vunpack.c.h.b16 %v90_v0  ;;  %v151_v2 = vunpack.c.l.b16 %v90_v0  ;;  %v401_v4 = vld [vmem:[#allocation5 + $0x48] sm:$0xf0]  ;;  %v399_v7 = vld [vmem:[#allocation5 + $0x30] sm:$0xf]  ;;  %v440_v8 = vld [vmem:[#allocation5 + $0x44] sm:$0xf0] }
  0x16   :  { %v92_v9 = vld [vmem:[#allocation5 + $0x70] sm:$0x33]  ;;  %v404_v13 = vor.u32 %v437_v3, %v401_v4  ;;  %v431_v14 = vld [vmem:[#allocation5 + $0x4] sm:$0xf]  ;;  %v400_v15 = vor.u32 %v440_v8, %v399_v7  ;;  %v377_v16 = vld [vmem:[#allocation5 + $0x18] sm:$0xf0] }
  0x17   :  { %v170_v5 = vpack.c.b16 %v152_v1, %v152_v1  ;;  %v169_v6 = vpack.c.b16 %v151_v2, %v151_v2  ;;  %v156_v10 = vunpack.c.h.b16 %v92_v9  ;;  %v375_v17 = vld [vmem:[#allocation5] sm:$0xf]  ;;  %v434_v18 = vld [vmem:[#allocation5 + $0x14] sm:$0xf0]  ;;  %v380_v20 = vor.u32 %v431_v14, %v377_v16  ;;  %v439_v23 = vld [vmem:[#allocation5 + $0x44] sm:$0xf] }
  0x18   :  { %v376_v21 = vor.u32 %v434_v18, %v375_v17  ;;  %v417_v24 = vld [vmem:[#allocation5 + $0x58] sm:$0xf0]  ;;  %vm187_vm1 = vcmask 293888   ;;  %v433_v27 = vld [vmem:[#allocation5 + $0x14] sm:$0xf]  ;;  %v155_v31 = vunpack.c.l.b16 %v92_v9  ;;  %s555_s2 = smov 32  }
  0x19   :  { %v196_v11 = vsel %vm191_vm0, %v170_v5, 0  ;;  %v193_v12 = vsel %vm191_vm0, %v169_v6, 0  ;;  %v174_v19 = vpack.c.b16 %v156_v10, %v156_v10  ;;  %v420_v26 = vor.u32 %v439_v23, %v417_v24  ;;  %v393_v28 = vld [vmem:[#allocation5 + $0x28] sm:$0xf0]  ;;  %v407_v34 = vld [vmem:[#allocation5 + $0x38] sm:$0xf] }
  0x1a   :  { %229 = vmatpush.bf16.msra.mxu1 %v196_v11  ;;  %215 = vmatpush.bf16.msra.mxu0 %v193_v12  ;;  %v396_v29 = vor.u32 %v433_v27, %v393_v28  ;;  %v91_v30 = vld [vmem:[#allocation5 + $0x68] sm:$0x33]  ;;  %v441_v35 = vld [vmem:[#allocation5 + $0x4c] sm:$0xf0]  ;;  %v438_v36 = vld [vmem:[#allocation5 + $0x3c] sm:$0xf]  ;;  %v173_v37 = vpack.c.b16 %v155_v31, %v155_v31 }
  0x1b   :  { %v208_v22 = vsel %vm191_vm0, %v174_v19, 0  ;;  %v153_v32 = vunpack.c.l.b16 %v91_v30  ;;  %v154_v33 = vunpack.c.h.b16 %v91_v30  ;;  %v409_v41 = vld [vmem:[#allocation5 + $0x50] sm:$0xf0]  ;;  %v415_v42 = vld [vmem:[#allocation5 + $0x40] sm:$0xf]  ;;  %v408_v48 = vor.u32 %v441_v35, %v407_v34  ;;  %s617_s3 = sld [smem:[#allocation8]] }
  0x1c   :  { %v442_v43 = vld [vmem:[#allocation5 + $0x54] sm:$0xf0]  ;;  %v205_v44 = vsel %vm191_vm0, %v173_v37, 0  ;;  %v412_v49 = vor.u32 %v438_v36, %v409_v41  ;;  %v383_v50 = vld [vmem:[#allocation5 + $0x8] sm:$0xf]  ;;  %vm339_vm3 = vcmask 261120  }
  0x1d   :  { %v171_v39 = vpack.c.b16 %v153_v32, %v153_v32  ;;  %v172_v40 = vpack.c.b16 %v154_v33, %v154_v33  ;;  %v416_v47 = vor.u32 %v442_v43, %v415_v42  ;;  %v391_v51 = vld [vmem:[#allocation5 + $0x10] sm:$0xf]  ;;  %v436_v52 = vld [vmem:[#allocation5 + $0x24] sm:$0xf0]  ;;  %v435_v53 = vld [vmem:[#allocation5 + $0x1c] sm:$0xf0] }
  0x1e   :  { %230 = vmatpush.bf16.msra.mxu1 %v404_v13  ;;  %216 = vmatpush.bf16.msra.mxu0 %v400_v15  ;;  %v432_v54 = vld [vmem:[#allocation5 + $0xc] sm:$0xf]  ;;  %v385_v55 = vld [vmem:[#allocation5 + $0x20] sm:$0xf0]  ;;  %v605_v56 = vld [vmem:[#allocation7] sm:$0x3f]  ;;  %v392_v57 = vor.u32 %v436_v52, %v391_v51  ;;  %v384_v59 = vor.u32 %v435_v53, %v383_v50 }
  0x1f   :  { %v199_v45 = vsel %vm191_vm0, %v171_v39, 0  ;;  %v202_v46 = vsel %vm191_vm0, %v172_v40, 0  ;;  %v95_v58 = vperm.slane %v605_v56, 0  ;;  %v388_v60 = vor.u32 %v432_v54, %v385_v55  ;;  %s429_s10 = sld [smem:[#allocation8 + $0x1]]  ;;  %s556_s11 = smov 96  }
  0x20   :  { %243 = vmatpush.bf16.msra.mxu2 %v199_v45  ;;  %257 = vmatpush.bf16.msra.mxu3 %v202_v46  ;;  %v100_v0 = vperm.slane %v605_v56, 5  ;;  %v96_v15 = vperm.slane %v605_v56, 1  ;;  %v98_v24 = vperm.slane %v605_v56, 3  ;;  %v99_v32 = vperm.slane %v605_v56, 4 }
  0x21   :  { %vm359_vm5 = vcmask 7168  }
  0x22   :  { %231 = vmatpush.bf16.msra.mxu1 %v380_v20  ;;  %217 = vmatpush.bf16.msra.mxu0 %v376_v21 }
  0x24   :  { %244 = vmatpush.bf16.msra.mxu2 %v408_v48  ;;  %258 = vmatpush.bf16.msra.mxu3 %v412_v49 }
  0x25   :  { %422 = vmatmul.msk.bf16.vlgmr.msra.gmra.mxu1 %vm187_vm1, %v430_v25  ;;  %421 = vmatmul.msk.bf16.vlgmr.msra.gmra.mxu0 %vm187_vm1, %v430_v25 }
  0x26   :  { %285 = vmatpush.bf16.msrb.mxu1 %v208_v22  ;;  %271 = vmatpush.bf16.msrb.mxu0 %v205_v44  ;;  %v97_v22 = vperm.slane %v605_v56, 2  ;;  %v332_v44 = vstv %s617_s3 }
  0x28   :  { %245 = vmatpush.bf16.msra.mxu2 %v384_v59  ;;  %259 = vmatpush.bf16.msra.mxu3 %v388_v60 }
  0x2a   :  { %286 = vmatpush.bf16.msrb.mxu1 %v420_v26  ;;  %272 = vmatpush.bf16.msrb.mxu0 %v416_v47 }
  0x2b   :  { %423 = vmatmul.msk.bf16.vlgmr.msra.gmra.mxu2 %vm187_vm1, %v430_v25  ;;  %424 = vmatmul.msk.bf16.vlgmr.msra.gmra.mxu3 %vm187_vm1, %v430_v25 }
  0x2e   :  { %287 = vmatpush.bf16.msrb.mxu1 %v396_v29  ;;  %273 = vmatpush.bf16.msrb.mxu0 %v392_v57 }
  0x35   :  { %426 = vmatmul.msk.bf16.vlgmr.msrb.gmra.mxu1 %vm187_vm1, %v430_v25  ;;  %425 = vmatmul.msk.bf16.vlgmr.msrb.gmra.mxu0 %vm187_vm1, %v430_v25 }
  0xa2   :  { %v233_v38 = vpop.f32.mrf.mxu1  ;;  %v219_v61 = vpop.f32.mrf.mxu0 }
  0xa3   :  { %v220_v63 = vadd.f32 %v219_v61, %v95_v58  ;;  %v234_v17 = vadd.f32 %v233_v38, %v96_v15 }
  0xa5   :  { %v294_v1 = vand.u32 2147483647, %v220_v63 }
  0xaa   :  { %v235_v62 = vpop.f32.mrf.mxu1  ;;  %v221_v4 = vpop.f32.mrf.mxu0 }
  0xab   :  { %v222_v6 = vadd.f32 %v221_v4, %v95_v58  ;;  %v236_v27 = vadd.f32 %v235_v62, %v96_v15 }
  0xad   :  { %v295_v8 = vand.u32 2147483647, %v222_v6 }
  0xae   :  { %v247_v23 = vpop.f32.mrf.mxu2  ;;  %v261_v25 = vpop.f32.mrf.mxu3 }
  0xaf   :  { %v248_v29 = vadd.f32 %v247_v23, %v97_v22  ;;  %v262_v30 = vadd.f32 %v261_v25, %v98_v24 }
  0xb1   :  { %v296_v36 = vand.u32 2147483647, %v248_v29  ;;  %v298_v37 = vmax.f32 %v262_v30, 0.0 }
  0xb2   :  { %v289_v2 = vpop.f32.mrf.mxu1  ;;  %v275_v33 = vpop.f32.mrf.mxu0 }
  0xb3   :  { %v290_v3 = vadd.f32 %v289_v2, %v100_v0  ;;  %v276_v39 = vadd.f32 %v275_v33, %v99_v32 }
  0xb5   :  { %v300_v5 = vmul.f32 %v294_v1, %v290_v3  ;;  %v335_v46 = vmul.f32 %v298_v37, %v276_v39 }
  0xb6   :  { %v249_v41 = vpop.f32.mrf.mxu2  ;;  %v263_v43 = vpop.f32.mrf.mxu3 }
  0xb7   :  { %302 = vrot.lane.b32.xlu0 %v300_v5, %s551_s27  ;;  %v250_v47 = vadd.f32 %v249_v41, %v97_v22  ;;  %v264_v48 = vadd.f32 %v263_v43, %v98_v24 }
  0xb9   :  { %v297_v53 = vand.u32 2147483647, %v250_v47  ;;  %v299_v55 = vmax.f32 %v264_v48, 0.0 }
  0xba   :  { %v291_v7 = vpop.f32.mrf.mxu1  ;;  %v277_v50 = vpop.f32.mrf.mxu0 }
  0xbb   :  { %v292_v9 = vadd.f32 %v291_v7, %v100_v0  ;;  %v278_v56 = vadd.f32 %v277_v50, %v99_v32  ;;  %v346_v0 = vstv %s429_s10 }
  0xbd   :  { %v301_v10 = vmul.f32 %v295_v8, %v292_v9  ;;  %v336_v60 = vmul.f32 %v299_v55, %v278_v56 }
  0xbf   :  { %304 = vrot.lane.b32.xlu0 %v301_v10, %s551_s27 }
 0x129   :  { %v303_v11 = vpop.permute.xlu0 %302 }
 0x12a   :  { %v306_v12 = vadd.f32 %v303_v11, %v300_v5 }
 0x12c   :  { %308 = vrot.lane.b32.xlu1 %v306_v12, %s555_s2 }
 0x131   :  { %v305_v13 = vpop.permute.xlu0 %304 }
 0x132   :  { %v307_v14 = vadd.f32 %v305_v13, %v301_v10 }
 0x134   :  { %310 = vrot.lane.b32.xlu1 %v307_v14, %s555_s2 }
 0x19e   :  { %v309_v16 = vpop.permute.xlu1 %308 }
 0x19f   :  { %v312_v18 = vadd.f32 %v309_v16, %v306_v12 }
 0x1a1   :  { %v314_v19 = vadd.f32 %v312_v18, %v234_v17 }
 0x1a3   :  { %v318_v20 = vmin.f32 %v314_v19, 0.0  ;;  %vm316_vm2 = vcmp.gt.f32.partialorder %v314_v19, 0.0 }
 0x1a5   :  { %v320_v21 = vmul.f32 1.442695, %v318_v20 }
 0x1a6   :  { %v311_v26 = vpop.permute.xlu1 %310 }
 0x1a7   :  { %453 = vpow2.f32 %v320_v21  ;;  %v313_v28 = vadd.f32 %v311_v26, %v307_v14 }
 0x1a9   :  { %v315_v31 = vadd.f32 %v313_v28, %v236_v27 }
 0x1ab   :  { %v319_v34 = vmin.f32 %v315_v31, 0.0  ;;  %vm317_vm4 = vcmp.gt.f32.partialorder %v315_v31, 0.0 }
 0x1ad   :  { %v454_v35 = vpop.eup %453  ;;  %v322_v38 = vmul.f32 1.442695, %v319_v34 }
 0x1ae   :  { %v427_v40 = vadd.f32 -1.0, %v454_v35 }
 0x1af   :  { %455 = vpow2.f32 %v322_v38 }
 0x1b0   :  { %v326_v42 = vsel %vm316_vm2, %v314_v19, %v427_v40 }
 0x1b1   :  { %v330_v45 = vmul.f32 %v326_v42, %v296_v36 }
 0x1b3   :  { %v333_v49 = vmul.f32 %v332_v44, %v330_v45 }
 0x1b5   :  { %v456_v51 = vpop.eup %455  ;;  %v337_v52 = vadd.f32 %v335_v46, %v333_v49 }
 0x1b6   :  { %v428_v54 = vadd.f32 -1.0, %v456_v51 }
 0x1b7   :  { %v340_v57 = vsel %vm339_vm3, %v337_v52, 0.0 }
 0x1b8   :  { %v327_v58 = vsel %vm317_vm4, %v315_v31, %v428_v54  ;;  %341 = vadd.xlane.f32.xlu2 %v340_v57 }
 0x1b9   :  { %v331_v59 = vmul.f32 %v327_v58, %v297_v53 }
 0x1bb   :  { %v334_v61 = vmul.f32 %v332_v44, %v331_v59 }
 0x1bd   :  { %v338_v62 = vadd.f32 %v336_v60, %v334_v61 }
 0x1bf   :  { %v343_v63 = vsel %vm339_vm3, %v338_v62, 0.0 }
 0x1c0   :  { %344 = vadd.xlane.f32.xlu2 %v343_v63 }
 0x22b   :  { %v342_v1 = vpop.xlane.xlu2 %341 }
 0x22c   :  { %v347_v2 = vadd.f32 %v346_v0, %v342_v1 }
 0x22e   :  { %v349_v3 = vadd.f32 %v347_v2, %v234_v17 }
 0x230   :  { %353 = vrot.lane.b32.xlu0 %v349_v3, %s556_s11 }
 0x233   :  { %v345_v4 = vpop.xlane.xlu2 %344 }
 0x234   :  { %v348_v5 = vadd.f32 %v346_v0, %v345_v4 }
 0x236   :  { %v350_v6 = vadd.f32 %v348_v5, %v236_v27 }
 0x238   :  { %355 = vrot.lane.b32.xlu1 %v350_v6, %s556_s11 }
 0x2a2   :  { %v354_v7 = vpop.permute.xlu0 %353 }
 0x2a3   :  { %360 = vst.msk [vmem:[%s631_s4] sm:$0xff] %vm359_vm5, %v354_v7 }
 0x2aa   :  { %v356_v8 = vpop.permute.xlu1 %355 }
 0x2ab   :  { %361 = vst.msk [vmem:[%s631_s4 + $0x8] sm:$0xff] %vm359_vm5, %v356_v8 }
 0x2ac   :  { %366 = vsyncpa [#allocation3], 1 }
 0x2ad   :  { %367 = vsyncpa [#allocation6], 1 }
 0x2ae   :  { %368 = vsyncpa [#allocation4], 1 }

</bundles_post_ra>
